<compile_context>
chip_gen: v7x
topology: tpu7x:2x2x1
jax: 0.10.0
libtpu: 0.0.40
codegen_flags: <defaults>
</compile_context>

<pallas_src>
import functools

import jax
import jax.numpy as jnp
from jax import lax
from jax.experimental import pallas as pl
from jax.experimental.pallas import tpu as pltpu


def _segment_embed(segtab_ref, sid, n_segment, out_dtype, nrows_shape):
    """sid: (rows, 1) int32 -> (rows, Dp) segment embedding (VPU only)."""
    seg0 = segtab_ref[0, :]                                   # (Dp,)
    if n_segment == 2:
        delta = segtab_ref[1, :] - seg0                       # (Dp,)
        return seg0[None, :] + sid.astype(out_dtype) * delta[None, :]
    seg_emb = jnp.broadcast_to(seg0[None, :], nrows_shape)
    for s in range(1, n_segment):
        seg_emb = jnp.where(sid == s, segtab_ref[s, :][None, :], seg_emb)
    return seg_emb


def _bert_embed_gather_kernel(seq_ref, seg_ref, tok_hbm, segtab_ref, pos_ref,
                              out_ref, gbuf, sems, *,
                              seq_tile, chunk, n_slots, n_segment):
    """HBM token-table path: chunked, ring-buffered row-gather DMAs.

    seq_ref    : SMEM (B, L) int32            scalar-prefetched token ids
    seg_ref    : VMEM (1, seq_tile, 1) int32  segment ids for this tile
    tok_hbm    : HBM  (V, Dp)                 token table (row-gathered)
    segtab_ref : VMEM (S, Dp)                 segment table (tiny)
    pos_ref    : VMEM (seq_tile, Dp)          position rows (resident over B)
    out_ref    : VMEM (1, seq_tile, Dp)
    gbuf       : VMEM (seq_tile, Dp)          gather destination scratch
    sems       : DMA semaphore ring (n_slots,), one slot per in-flight chunk
    """
    j = pl.program_id(0)          # sequence-tile index (outer grid axis)
    b = pl.program_id(1)          # batch row (inner grid axis)
    base = j * seq_tile
    n_chunks = seq_tile // chunk
    out_dtype = out_ref.dtype

    def issue_chunk(c, slot):
        # `chunk` row DMAs, all signalling the same semaphore slot.
        row0 = c * chunk
        for r in range(chunk):                       # static unroll
            tid = seq_ref[b, base + row0 + r]
            pltpu.make_async_copy(tok_hbm.at[pl.ds(tid, 1)],
                                  gbuf.at[pl.ds(row0 + r, 1)],
                                  sems.at[slot]).start()

    def wait_chunk(c, slot):
        # Shape-only wait: (chunk, Dp) bytes == sum of the chunk's row copies.
        row0 = c * chunk
        region = gbuf.at[pl.ds(row0, chunk)]
        pltpu.make_async_copy(region, region, sems.at[slot]).wait()

    # Prime the ring: n_slots chunks (n_slots * chunk rows) in flight.
    for c in range(n_slots):
        issue_chunk(c, c)

    def body(c, carry):
        slot = lax.bitwise_and(c, n_slots - 1)       # n_slots is a power of 2
        wait_chunk(c, slot)

        @pl.when(c + n_slots < n_chunks)
        def _():
            issue_chunk(c + n_slots, slot)           # refill the ring ASAP

        # Fused compute + lane-dense store for this chunk; overlaps with the
        # chunks still in flight.
        row0 = pl.multiple_of(c * chunk, chunk)
        tok = gbuf[pl.ds(row0, chunk), :]                       # (chunk, Dp)
        sid = seg_ref[0, pl.ds(row0, chunk), :]                 # (chunk, 1)
        seg_emb = _segment_embed(segtab_ref, sid, n_segment, out_dtype,
                                 tok.shape)
        pos = pos_ref[pl.ds(row0, chunk), :]
        out_ref[0, pl.ds(row0, chunk), :] = (tok + seg_emb + pos).astype(out_dtype)
        return carry

    lax.fori_loop(0, n_chunks, body, 0,
                  unroll=True if n_chunks <= 4 else None)


def _bert_embed_resident_kernel(seq_ref, seg_ref, tok_ref, segtab_ref, pos_ref,
                                out_ref, gbuf, *, seq_tile, n_segment):
    """VMEM-resident token-table path: in-VMEM dynamic row reads, no HBM DMAs."""
    j = pl.program_id(0)
    b = pl.program_id(1)
    base = j * seq_tile
    out_dtype = out_ref.dtype

    def gather(i, carry):
        tid = seq_ref[b, base + i]
        gbuf[pl.ds(i, 1), :] = tok_ref[pl.ds(tid, 1), :]
        return carry

    lax.fori_loop(0, seq_tile, gather, 0,
                  unroll=8 if seq_tile >= 8 else True)

    sid = seg_ref[0]                                            # (seq_tile, 1)
    tok = gbuf[...]
    seg_emb = _segment_embed(segtab_ref, sid, n_segment, out_dtype, tok.shape)
    out_ref[0] = (tok + seg_emb + pos_ref[...]).astype(out_dtype)


def bert_embedding(seq, seg, tok_table, seg_table, pos_table, *,
                   seq_tile=None, chunk=None, force_hbm_gather=False):
    """seq, seg: int [B, L]; tables: [V,D], [S,D], [L,D]; returns [B, L, D]."""
    B, L = seq.shape
    V, D = tok_table.shape
    S = seg_table.shape[0]
    assert pos_table.shape == (L, D), "forward() requires seq length == max_len"

    dtype = tok_table.dtype
    seg_table = seg_table.astype(dtype)
    pos_table = pos_table.astype(dtype)

    # Lane-dense embedding dim: pad D up to a multiple of 128 so row DMAs and
    # output stores are full-lane (unmasked).
    Dp = (-(-D // 128)) * 128
    if Dp != D:
        # TODO(synk): non-128-multiple D forces a wrapper-side slice of the
        # padded output (an extra HBM pass); production D (768/1024) avoids it.
        pad = ((0, 0), (0, Dp - D))
        tok_table = jnp.pad(tok_table, pad)
        seg_table = jnp.pad(seg_table, pad)
        pos_table = jnp.pad(pos_table, pad)

    # Sequence tile: biggest reasonable tile (fewer, larger grid steps).
    if seq_tile is None:
        seq_tile = L if L <= 512 else 512
    if L % seq_tile != 0:
        seq_tile = L
    nj = L // seq_tile
    # v7x megacore: make sure there are >= 2 grid steps so both TCs get work.
    if B * nj < 2 and seq_tile % 2 == 0 and seq_tile >= 16:
        seq_tile //= 2
        nj = L // seq_tile

    itemsize = jnp.dtype(dtype).itemsize
    blk = seq_tile * Dp * itemsize
    table_bytes = V * Dp * itemsize
    # out (x2) + pos (x2) + gather scratch + segment table (x2) + slack.
    pipeline_bytes = 4 * blk + blk + 2 * S * Dp * itemsize + (1 << 20)

    try:
        info = pltpu.get_tpu_info()
        vmem_cap = int(getattr(info, "vmem_capacity_bytes", 64 << 20))
    except Exception:
        vmem_cap = 64 << 20
    resident = ((not force_hbm_gather)
                and (2 * table_bytes + pipeline_bytes <= int(0.8 * vmem_cap)))

    seq_i32 = seq.astype(jnp.int32)                  # scalar-prefetch ids (SMEM)
    seg3 = seg.astype(jnp.int32).reshape(B, L, 1)    # vector ids (VMEM blocks)

    # Grid (nj, B): pos block index is constant across the inner batch axis,
    # so each pos tile is DMA'd once and stays resident.
    grid = (nj, B)
    seg_spec = pl.BlockSpec((1, seq_tile, 1), lambda j, b, seq: (b, j, 0))
    segtab_spec = pl.BlockSpec((S, Dp), lambda j, b, seq: (0, 0))
    pos_spec = pl.BlockSpec((seq_tile, Dp), lambda j, b, seq: (j, 0))
    out_spec = pl.BlockSpec((1, seq_tile, Dp), lambda j, b, seq: (b, j, 0))

    if resident:
        kernel = functools.partial(_bert_embed_resident_kernel,
                                   seq_tile=seq_tile, n_segment=S)
        tok_spec = pl.BlockSpec((V, Dp), lambda j, b, seq: (0, 0))  # resident
        scratch = [pltpu.VMEM((seq_tile, Dp), dtype)]
        vmem_need = 2 * table_bytes + pipeline_bytes
    else:
        # HBM gather: chunked, ring-buffered row DMAs (up to 64 rows in flight).
        if chunk is None:
            chunk = 16
        while seq_tile % chunk != 0:
            chunk //= 2
        chunk = max(chunk, 1)
        n_chunks = seq_tile // chunk
        n_slots = 1
        while n_slots * 2 <= min(n_chunks, 4):
            n_slots *= 2
        kernel = functools.partial(_bert_embed_gather_kernel,
                                   seq_tile=seq_tile, chunk=chunk,
                                   n_slots=n_slots, n_segment=S)
        tok_spec = pl.BlockSpec(memory_space=pl.ANY)       # token table in HBM
        scratch = [pltpu.VMEM((seq_tile, Dp), dtype),
                   pltpu.SemaphoreType.DMA((n_slots,))]
        vmem_need = pipeline_bytes

    vmem_limit = int(min(max(vmem_need + (8 << 20), 32 << 20),
                         int(0.9 * vmem_cap)))

    out = pl.pallas_call(
        kernel,
        out_shape=jax.ShapeDtypeStruct((B, L, Dp), dtype),
        grid_spec=pltpu.PrefetchScalarGridSpec(
            num_scalar_prefetch=1,
            grid=grid,
            in_specs=[seg_spec, tok_spec, segtab_spec, pos_spec],
            out_specs=out_spec,
            scratch_shapes=scratch,
        ),
        compiler_params=pltpu.CompilerParams(
            dimension_semantics=("parallel", "parallel"),
            vmem_limit_bytes=vmem_limit),
    )(seq_i32, seg3, tok_table, seg_table, pos_table)

    return out[..., :D] if Dp != D else out


def _reference(seq, seg, tok_table, seg_table, pos_table):
    L = seq.shape[1]
    return tok_table[seq] + seg_table[seg] + pos_table[jnp.arange(L)][None]


if __name__ == "__main__":
    key = jax.random.PRNGKey(0)

    def make_case(key, vocab_size, n_segment, max_len, embed_dim, batch):
        k_tok, k_seg, k_pos, k_ids, k_sids = jax.random.split(key, 5)
        tok_table = jax.random.normal(k_tok, (vocab_size, embed_dim), jnp.float32)
        seg_table = jax.random.normal(k_seg, (n_segment, embed_dim), jnp.float32)
        pos_table = jax.random.normal(k_pos, (max_len, embed_dim), jnp.float32)
        seq = jax.random.randint(k_ids, (batch, max_len), 0, vocab_size, jnp.int32)
        seg = jax.random.randint(k_sids, (batch, max_len), 0, n_segment, jnp.int32)
        return seq, seg, tok_table, seg_table, pos_table

    k1, k2 = jax.random.split(key)

    # Case 1: small, module-consistent shapes (exercises both table paths).
    case1 = make_case(k1, vocab_size=32, n_segment=2, max_len=8,
                      embed_dim=32, batch=2)
    ref1 = _reference(*case1)
    for force in (False, True):
        out = jax.block_until_ready(bert_embedding(*case1,
                                                   force_hbm_gather=force))
        assert out.shape == ref1.shape
        assert jnp.allclose(out, ref1, atol=1e-5, rtol=1e-5)

    # Case 2: longer sequence -> multi-chunk DMA ring on the HBM-gather path.
    case2 = make_case(k2, vocab_size=1000, n_segment=2, max_len=128,
                      embed_dim=256, batch=2)
    ref2 = _reference(*case2)
    for force in (False, True):
        out = jax.block_until_ready(bert_embedding(*case2,
                                                   force_hbm_gather=force))
        assert out.shape == ref2.shape
        assert jnp.allclose(out, ref2, atol=1e-5, rtol=1e-5)

    print("KERNEL_OK")
</pallas_src>

<mosaic_0001>
module attributes {stable_mosaic.version = 11 : i64} {
  func.func @_bert_embed_resident_kernel(%arg0: i32, %arg1: i32, %arg2: memref<2x8xi32, #tpu.memory_space<smem>>, %arg3: memref<1x8x1xi32, #tpu.memory_space<vmem>>, %arg4: memref<32x128xf32, #tpu.memory_space<vmem>>, %arg5: memref<2x128xf32, #tpu.memory_space<vmem>>, %arg6: memref<8x128xf32, #tpu.memory_space<vmem>>, %arg7: memref<1x8x128xf32, #tpu.memory_space<vmem>>, %arg8: memref<8x128xf32, #tpu.memory_space<vmem>>) attributes {dimension_semantics = [#tpu.dimension_semantics<parallel>, #tpu.dimension_semantics<parallel>], iteration_bounds = array<i64: 1, 2>, scalar_prefetch = 1 : i64, scratch_operands = 1 : i64, tpu.core_type = #tpu.core_type<tc>, window_params = [{transform_indices = @transform_0, window_bounds = array<i64: 1, 8, 1>}, {pipeline_mode = #tpu.pipeline_mode<synchronous>, transform_indices = @transform_1, window_bounds = array<i64: 32, 128>}, {pipeline_mode = #tpu.pipeline_mode<synchronous>, transform_indices = @transform_2, window_bounds = array<i64: 2, 128>}, {transform_indices = @transform_3, window_bounds = array<i64: 8, 128>}, {transform_indices = @transform_4, window_bounds = array<i64: 1, 8, 128>}]} {
    %c8_i32 = arith.constant 8 : i32
    %0 = arith.muli %arg0, %c8_i32 : i32
    %c0_i32 = arith.constant 0 : i32
    %1 = arith.addi %0, %c0_i32 : i32
    %2 = arith.index_cast %arg1 : i32 to index
    %3 = arith.index_cast %1 : i32 to index
    %4 = memref.load %arg2[%2, %3] : memref<2x8xi32, #tpu.memory_space<smem>>
    %5 = arith.index_cast %4 : i32 to index
    %c0 = arith.constant 0 : index
    %6 = vector.load %arg4[%5, %c0] : memref<32x128xf32, #tpu.memory_space<vmem>>, vector<1x128xf32>
    %7 = arith.index_cast %c0_i32 : i32 to index
    %c0_0 = arith.constant 0 : index
    %8 = vector.load %arg8[%7, %c0_0] : memref<8x128xf32, #tpu.memory_space<vmem>>, vector<1x128xf32>
    tpu.vector_store %arg8[%7, %c0_0], %6 {strides = array<i32>} : memref<8x128xf32, #tpu.memory_space<vmem>>, vector<1x128xf32>,
    %c1_i32 = arith.constant 1 : i32
    %9 = arith.addi %0, %c1_i32 : i32
    %10 = arith.index_cast %arg1 : i32 to index
    %11 = arith.index_cast %9 : i32 to index
    %12 = memref.load %arg2[%10, %11] : memref<2x8xi32, #tpu.memory_space<smem>>
    %13 = arith.index_cast %12 : i32 to index
    %c0_1 = arith.constant 0 : index
    %14 = vector.load %arg4[%13, %c0_1] : memref<32x128xf32, #tpu.memory_space<vmem>>, vector<1x128xf32>
    %15 = arith.index_cast %c1_i32 : i32 to index
    %c0_2 = arith.constant 0 : index
    %16 = vector.load %arg8[%15, %c0_2] : memref<8x128xf32, #tpu.memory_space<vmem>>, vector<1x128xf32>
    tpu.vector_store %arg8[%15, %c0_2], %14 {strides = array<i32>} : memref<8x128xf32, #tpu.memory_space<vmem>>, vector<1x128xf32>,
    %c2_i32 = arith.constant 2 : i32
    %17 = arith.addi %0, %c2_i32 : i32
    %18 = arith.index_cast %arg1 : i32 to index
    %19 = arith.index_cast %17 : i32 to index
    %20 = memref.load %arg2[%18, %19] : memref<2x8xi32, #tpu.memory_space<smem>>
    %21 = arith.index_cast %20 : i32 to index
    %c0_3 = arith.constant 0 : index
    %22 = vector.load %arg4[%21, %c0_3] : memref<32x128xf32, #tpu.memory_space<vmem>>, vector<1x128xf32>
    %23 = arith.index_cast %c2_i32 : i32 to index
    %c0_4 = arith.constant 0 : index
    %24 = vector.load %arg8[%23, %c0_4] : memref<8x128xf32, #tpu.memory_space<vmem>>, vector<1x128xf32>
    tpu.vector_store %arg8[%23, %c0_4], %22 {strides = array<i32>} : memref<8x128xf32, #tpu.memory_space<vmem>>, vector<1x128xf32>,
    %c3_i32 = arith.constant 3 : i32
    %25 = arith.addi %0, %c3_i32 : i32
    %26 = arith.index_cast %arg1 : i32 to index
    %27 = arith.index_cast %25 : i32 to index
    %28 = memref.load %arg2[%26, %27] : memref<2x8xi32, #tpu.memory_space<smem>>
    %29 = arith.index_cast %28 : i32 to index
    %c0_5 = arith.constant 0 : index
    %30 = vector.load %arg4[%29, %c0_5] : memref<32x128xf32, #tpu.memory_space<vmem>>, vector<1x128xf32>
    %31 = arith.index_cast %c3_i32 : i32 to index
    %c0_6 = arith.constant 0 : index
    %32 = vector.load %arg8[%31, %c0_6] : memref<8x128xf32, #tpu.memory_space<vmem>>, vector<1x128xf32>
    tpu.vector_store %arg8[%31, %c0_6], %30 {strides = array<i32>} : memref<8x128xf32, #tpu.memory_space<vmem>>, vector<1x128xf32>,
    %c4_i32 = arith.constant 4 : i32
    %33 = arith.addi %0, %c4_i32 : i32
    %34 = arith.index_cast %arg1 : i32 to index
    %35 = arith.index_cast %33 : i32 to index
    %36 = memref.load %arg2[%34, %35] : memref<2x8xi32, #tpu.memory_space<smem>>
    %37 = arith.index_cast %36 : i32 to index
    %c0_7 = arith.constant 0 : index
    %38 = vector.load %arg4[%37, %c0_7] : memref<32x128xf32, #tpu.memory_space<vmem>>, vector<1x128xf32>
    %39 = arith.index_cast %c4_i32 : i32 to index
    %c0_8 = arith.constant 0 : index
    %40 = vector.load %arg8[%39, %c0_8] : memref<8x128xf32, #tpu.memory_space<vmem>>, vector<1x128xf32>
    tpu.vector_store %arg8[%39, %c0_8], %38 {strides = array<i32>} : memref<8x128xf32, #tpu.memory_space<vmem>>, vector<1x128xf32>,
    %c5_i32 = arith.constant 5 : i32
    %41 = arith.addi %0, %c5_i32 : i32
    %42 = arith.index_cast %arg1 : i32 to index
    %43 = arith.index_cast %41 : i32 to index
    %44 = memref.load %arg2[%42, %43] : memref<2x8xi32, #tpu.memory_space<smem>>
    %45 = arith.index_cast %44 : i32 to index
    %c0_9 = arith.constant 0 : index
    %46 = vector.load %arg4[%45, %c0_9] : memref<32x128xf32, #tpu.memory_space<vmem>>, vector<1x128xf32>
    %47 = arith.index_cast %c5_i32 : i32 to index
    %c0_10 = arith.constant 0 : index
    %48 = vector.load %arg8[%47, %c0_10] : memref<8x128xf32, #tpu.memory_space<vmem>>, vector<1x128xf32>
    tpu.vector_store %arg8[%47, %c0_10], %46 {strides = array<i32>} : memref<8x128xf32, #tpu.memory_space<vmem>>, vector<1x128xf32>,
    %c6_i32 = arith.constant 6 : i32
    %49 = arith.addi %0, %c6_i32 : i32
    %50 = arith.index_cast %arg1 : i32 to index
    %51 = arith.index_cast %49 : i32 to index
    %52 = memref.load %arg2[%50, %51] : memref<2x8xi32, #tpu.memory_space<smem>>
    %53 = arith.index_cast %52 : i32 to index
    %c0_11 = arith.constant 0 : index
    %54 = vector.load %arg4[%53, %c0_11] : memref<32x128xf32, #tpu.memory_space<vmem>>, vector<1x128xf32>
    %55 = arith.index_cast %c6_i32 : i32 to index
    %c0_12 = arith.constant 0 : index
    %56 = vector.load %arg8[%55, %c0_12] : memref<8x128xf32, #tpu.memory_space<vmem>>, vector<1x128xf32>
    tpu.vector_store %arg8[%55, %c0_12], %54 {strides = array<i32>} : memref<8x128xf32, #tpu.memory_space<vmem>>, vector<1x128xf32>,
    %c7_i32 = arith.constant 7 : i32
    %57 = arith.addi %0, %c7_i32 : i32
    %58 = arith.index_cast %arg1 : i32 to index
    %59 = arith.index_cast %57 : i32 to index
    %60 = memref.load %arg2[%58, %59] : memref<2x8xi32, #tpu.memory_space<smem>>
    %61 = arith.index_cast %60 : i32 to index
    %c0_13 = arith.constant 0 : index
    %62 = vector.load %arg4[%61, %c0_13] : memref<32x128xf32, #tpu.memory_space<vmem>>, vector<1x128xf32>
    %63 = arith.index_cast %c7_i32 : i32 to index
    %c0_14 = arith.constant 0 : index
    %64 = vector.load %arg8[%63, %c0_14] : memref<8x128xf32, #tpu.memory_space<vmem>>, vector<1x128xf32>
    tpu.vector_store %arg8[%63, %c0_14], %62 {strides = array<i32>} : memref<8x128xf32, #tpu.memory_space<vmem>>, vector<1x128xf32>,
    %c8_i32_15 = arith.constant 8 : i32
    %c0_16 = arith.constant 0 : index
    %c0_17 = arith.constant 0 : index
    %c0_18 = arith.constant 0 : index
    %65 = vector.load %arg3[%c0_16, %c0_17, %c0_18] : memref<1x8x1xi32, #tpu.memory_space<vmem>>, vector<1x8x1xi32>
    %66 = vector.shape_cast %65 : vector<1x8x1xi32> to vector<8x1xi32>
    %c0_19 = arith.constant 0 : index
    %c0_20 = arith.constant 0 : index
    %67 = vector.load %arg8[%c0_19, %c0_20] : memref<8x128xf32, #tpu.memory_space<vmem>>, vector<8x128xf32>
    %c0_21 = arith.constant 0 : index
    %c0_22 = arith.constant 0 : index
    %68 = vector.load %arg5[%c0_21, %c0_22] : memref<2x128xf32, #tpu.memory_space<vmem>>, vector<1x128xf32>
    %69 = vector.shape_cast %68 : vector<1x128xf32> to vector<128xf32>
    %c1 = arith.constant 1 : index
    %c0_23 = arith.constant 0 : index
    %70 = vector.load %arg5[%c1, %c0_23] : memref<2x128xf32, #tpu.memory_space<vmem>>, vector<1x128xf32>
    %71 = vector.shape_cast %70 : vector<1x128xf32> to vector<128xf32>
    %72 = arith.subf %71, %69 : vector<128xf32>
    %73 = vector.shape_cast %69 : vector<128xf32> to vector<1x128xf32>
    %74 = arith.sitofp %66 : vector<8x1xi32> to vector<8x1xf32>
    %75 = vector.shape_cast %72 : vector<128xf32> to vector<1x128xf32>
    %76 = vector.broadcast %74 : vector<8x1xf32> to vector<8x128xf32>
    %77 = vector.broadcast %75 : vector<1x128xf32> to vector<8x128xf32>
    %78 = arith.mulf %76, %77 : vector<8x128xf32>
    %79 = vector.broadcast %73 : vector<1x128xf32> to vector<8x128xf32>
    %80 = arith.addf %79, %78 : vector<8x128xf32>
    %81 = arith.addf %67, %80 : vector<8x128xf32>
    %c0_24 = arith.constant 0 : index
    %c0_25 = arith.constant 0 : index
    %82 = vector.load %arg6[%c0_24, %c0_25] : memref<8x128xf32, #tpu.memory_space<vmem>>, vector<8x128xf32>
    %83 = arith.addf %81, %82 : vector<8x128xf32>
    %c0_26 = arith.constant 0 : index
    %c0_27 = arith.constant 0 : index
    %c0_28 = arith.constant 0 : index
    %84 = vector.load %arg7[%c0_26, %c0_27, %c0_28] : memref<1x8x128xf32, #tpu.memory_space<vmem>>, vector<1x8x128xf32>
    %85 = vector.shape_cast %84 : vector<1x8x128xf32> to vector<8x128xf32>
    %86 = vector.shape_cast %83 : vector<8x128xf32> to vector<1x8x128xf32>
    tpu.vector_store %arg7[%c0_26, %c0_27, %c0_28], %86 {strides = array<i32>} : memref<1x8x128xf32, #tpu.memory_space<vmem>>, vector<1x8x128xf32>,
    return
  }
  func.func @transform_0(%arg0: i32, %arg1: i32, %arg2: memref<2x8xi32, #tpu.memory_space<smem>>) -> (i32, i32, i32) {
    %c0_i32 = arith.constant 0 : i32
    %c0_i32_0 = arith.constant 0 : i32
    return %arg1, %arg0, %c0_i32 : i32, i32, i32
  }
  func.func @transform_1(%arg0: i32, %arg1: i32, %arg2: memref<2x8xi32, #tpu.memory_space<smem>>) -> (i32, i32) {
    %c0_i32 = arith.constant 0 : i32
    %c0_i32_0 = arith.constant 0 : i32
    %c0_i32_1 = arith.constant 0 : i32
    return %c0_i32, %c0_i32_0 : i32, i32
  }
  func.func @transform_2(%arg0: i32, %arg1: i32, %arg2: memref<2x8xi32, #tpu.memory_space<smem>>) -> (i32, i32) {
    %c0_i32 = arith.constant 0 : i32
    %c0_i32_0 = arith.constant 0 : i32
    %c0_i32_1 = arith.constant 0 : i32
    return %c0_i32, %c0_i32_0 : i32, i32
  }
  func.func @transform_3(%arg0: i32, %arg1: i32, %arg2: memref<2x8xi32, #tpu.memory_space<smem>>) -> (i32, i32) {
    %c0_i32 = arith.constant 0 : i32
    %c0_i32_0 = arith.constant 0 : i32
    return %arg0, %c0_i32 : i32, i32
  }
  func.func @transform_4(%arg0: i32, %arg1: i32, %arg2: memref<2x8xi32, #tpu.memory_space<smem>>) -> (i32, i32, i32) {
    %c0_i32 = arith.constant 0 : i32
    %c0_i32_0 = arith.constant 0 : i32
    return %arg1, %arg0, %c0_i32 : i32, i32, i32
  }
}

</mosaic_0001>

<bundles_post_ra>
// kernel: tpu_custom_call.1
= control target key start
LH: loop header
LB: loop body
LE: loop exit
PB: predicated region body
PF: predicated region fallthrough
CT: control target
= control target key end

     0   :  { %s927_s0 = inlined_call_operand.vmem [shape: s32[2,8], index: 0, kind: input, shape index: {}]   ;;  %s928_s1 = inlined_call_operand.vmem [shape: s32[2,8,1], index: 1, kind: input, shape index: {}]   ;;  %s929_s2 = inlined_call_operand.hbm [shape: f32[32,128], index: 2, kind: input, shape index: {}]   ;;  %s930_s3 = inlined_call_operand.vmem [shape: f32[2,128], index: 3, kind: input, shape index: {}]   ;;  %s931_s4 = inlined_call_operand.vmem [shape: f32[8,128], index: 4, kind: input, shape index: {}]   ;;  %s932_s5 = inlined_call_operand.hbm [shape: f32[2,8,128], index: 5, kind: output, shape index: {}]  }
   0x1   :  { %940 = sst [smem:[#allocation16_spill]] %s929_s2  ;;  %s10_s20 = sshll.u32 %s927_s0, 4  ;;  %s11_s20 = int_to_ptr.vmem [resolvable:$true] %s10_s20 }
   0x2   :  { %s592_s21 = scalar_lea.vmem %s11_s20, 32  ;;  %p597_p1 = scmp.lt.s32.totalorder %s11_s20, %s11_s20 }
   0x3   :  { %p593_p0 = scmp.ne.s32.totalorder %s11_s20, %s592_s21  ;;  %p598_p2 = scmp.lt.s32.totalorder %s592_s21, %s592_s21 }
   0x5   :  { %p599_p3 = por %p598_p2, %p597_p1 }
   0x7   :  { %p600_p4 = pnand %p599_p3, %p593_p0 }
   0x9   :  { %603 = shalt.err (!%p600_p4)  }
   0xa   :  { %s718_s22 = smov [#allocation4]  }
   0xb   :  { %13 = dma.vmem_to_smem %s11_s20, 32, %s718_s22, [#allocation3] }
   0xc   :  { %684 = dma.done.wait [#allocation3], 32 }
   0xd   :  { %685 = vsyncadd [#allocation3], 4294967264 }
   0xe   :  { %15 = sfence }
   0xf   :  { %16 = vsyncpa [#allocation6], 0 }
  0x10   :  { %17 = vsyncpa [#allocation7], 0 }
  0x11   :  { %19 = vsyncpa [#allocation7 + $0x1], 0  ;;  %s757_s23 = smov 0   ;;  %s759_s24 = smov 0  }
  0x12   :  { %s761_s0 = smov 0   ;;  %s763_s25 = smov 0  }
  0x13   :  { %s765_s26 = smov 0   ;;  %s767_s27 = smov 0  }
  0x14 LB: > { %941 = sst [smem:[#allocation12_spill]] %s704_s0  ;;  %s499_s28 = sadd.s32 4294967295, %s716_s27   ;;  %s716_s27 = sphi %s767_s27, %s25_s27   ;;  %s712_s26 = sphi %s765_s26, %s958_s26   ;;  %s708_s25 = sphi %s763_s25, %s957_s25   ;;  %s704_s0 = sphi %s761_s0, %s956_s0   ;;  %s700_s24 = sphi %s759_s24, %s960_s24   ;;  %s696_s23 = sphi %s757_s23, %s959_s23  }
  0x15   : > { %942 = sst [smem:[#allocation13_spill]] %s712_s26  ;;  %s500_s29 = sadd.s32 4294967294, %s716_s27  }
  0x16   : > { %s34_s30 = sadd.s32 1, %s712_s26  ;;  %s142_s6 = sadd.s32 1, %s704_s0 }
  0x17   : > { %p35_p5 = scmp.ge.s32.totalorder %s34_s30, 2  ;;  %p152_p6 = scmp.ne.s32.totalorder %s704_s0, %s700_s24 }
  0x18   : > { %p153_p7 = scmp.eq.s32.totalorder %s499_s28, 1  ;;  %p158_p8 = scmp.ne.s32.totalorder %s700_s24, %s696_s23 }
  0x19   : > { %s962_s30 = smov (%p35_p5, %s34_s30), 0  ;;  %p159_p10 = scmp.eq.s32.totalorder %s500_s29, 1 }
  0x1a   : > { %943 = sst [smem:[#allocation14_spill]] %s962_s30  ;;  %p797_p9 = por %p153_p7, %p152_p6 }
  0x1b   : > { %s137_s8 = ssub.s32 %s712_s26, %s962_s30  ;;  %p501_p11 = scmp.ge.s32.totalorder %s716_s27, 1 }
  0x1c   : > { %s944_s7 = scalar_select %p797_p9, 1, 0 }
  0x1d   : > { %p140_p12 = scmp.eq.s32.totalorder %s137_s8, 0  ;;  %p804_p13 = por %p159_p10, %p158_p8 }
  0x1e   : > { %p166_p0 = scmp.lt.s32.totalorder %s716_s27, 3  ;;  %p816_p2 = scmp.eq.s32.totalorder %s499_s28, 0 }
  0x1f   : > { %s945_s9 = scalar_select %p804_p13, 1, 0 }
  0x20   : > { %s810_s10 = scalar_select %p140_p12, %s704_s0, %s142_s6  }
  0x21   : > { %p812_p1 = pnand %p501_p11, %p166_p0  ;;  %s719_s13 = smov [#allocation5]  }
  0x22   : > { %946 = sst [smem:[#allocation15_spill]] %s810_s10  ;;  %s178_s14 = sshll.u32 %s719_s13, 4  ;;  %s179_s14 = int_to_ptr.vmem [resolvable:$true] %s178_s14 }
  0x23   : > { %s947_s11 = scalar_select %p812_p1, 1, 0 }
  0x24   : > { %s948_s12 = scalar_select %p816_p2, 1, 0 }
  0x25   : > { %p527_p3 = pneg %p812_p1  ;;  %s950_s2 = sld [smem:[#allocation16_spill]] }
  0x27   : > { %p824_p4 = pnand %p816_p2, %p527_p3 }
  0x29   : > { %p606_p6 = pneg %p824_p4 }
  0x2b   : > { %s604_s18 = scalar_lea.hbm %s950_s2, 512 }
  0x2c   : > { %p605_p5 = scmp.ne.s32.totalorder %s950_s2, %s604_s18  ;;  %p611_p10 = scmp.lt.u32.totalorder %s604_s18, %s950_s2 }
  0x2e   : > { %p607_p7 = pnand %p606_p6, %p605_p5 }
  0x30   : > { %p608_p8 = pneg %p607_p7 }
  0x32   : > { %p613_p11 = pnand %p611_p10, %p608_p8 }
  0x34   : > { %616 = shalt.err (!%p613_p11)
}
  0x35   : > { %s617_s28 = scalar_lea.vmem %s179_s14, 512  ;;  %p625_p13 = scmp.lt.s32.totalorder %s179_s14, %s179_s14 }
  0x36   : > { %p618_p12 = scmp.ne.s32.totalorder %s179_s14, %s617_s28  ;;  %p626_p9 = scmp.lt.s32.totalorder %s617_s28, %s617_s28 }
  0x38   : > { %p620_p0 = pnand %p618_p12, %p606_p6  ;;  %p627_p2 = por %p626_p9, %p625_p13 }
  0x3a   : > { %p621_p3 = pneg %p620_p0 }
  0x3c   : > { %p628_p1 = pnand %p627_p2, %p621_p3 }
  0x3e   : > { %631 = shalt.err (!%p628_p1)
}
  0x3f   : > { %s720_s29 = smov 128   ;;  %s721_s6 = smov 8  }
  0x40   : > { %530 = dma.hbm_to_vmem [thread:$0]  (!%p824_p4), %s950_s2, 512, %s179_s14, [#allocation6], %s720_s29, %s720_s29, %s721_s6  }
  0x41   : > { %p951_p5 = scmp.ne.s32.totalorder %s947_s11, 0 }
  0x42   : > { %p952_p7 = scmp.ne.s32.totalorder (!%p951_p5), %s948_s12, 0 }
  0x43   : > { %214 = sbr.rel (%p951_p5) target bundleno = 233 (0xe9), region = 36 }
  0x4a   : > { %687 = dma.done.wait (%p952_p7), [#allocation6], 512  }
  0x4b   : > { %689 = vsyncadd (%p952_p7), [#allocation6], 4294966784  ;;  %p246_p9 = scmp.lt.s32.totalorder %s708_s25, 1  ;;  %s852_s16 = sshll.u32 %s708_s25, 7  ;;  %v722_v0 = vmov 0   ;;  %v364_v11 = vlaneseq  ;;  %v375_v23 = vld [vmem:[%s931_s4] sm:$0xff] }
  0x4c   : > { %591 = vset.pattern.permute.xlu0 %v722_v0  ;;  %s276_s11 = sadd.s32 1, %s852_s16  ;;  %s288_s12 = sadd.s32 2, %s852_s16  ;;  %v355_v13 = vld [vmem:[%s930_s3] sm:$0x1]  ;;  %v356_v14 = vld [vmem:[%s930_s3 + $0x1] sm:$0x1] }
  0x4d   : > { %s964_s25 = smov (!%p246_p9, %s708_s25), 1  ;;  %s300_s14 = sadd.s32 3, %s852_s16  ;;  %v365_v12 = vshrl.u32 %v364_v11, 7  ;;  %v357_v15 = vsub.f32 %v356_v14, %v355_v13 }
  0x4e   : > { %s508_s15 = sshll.u32 %s964_s25, 3  ;;  %s312_s17 = sadd.s32 4, %s852_s16 }
  0x4f   : > { %s252_s20 = scalar_lea.vmem %s928_s1, %s508_s15  ;;  %s324_s21 = sadd.s32 5, %s852_s16  ;;  %v366_v16 = vsub.s32 0, %v365_v12 }
  0x50   : > { %s336_s22 = sadd.s32 6, %s852_s16  ;;  %s265_s28 = sld [smem:[#allocation4 + %s852_s16]]  ;;  %v353_v1 = vld [vmem:[%s252_s20] sm:$0xff] }
  0x51   : > { %s348_s29 = sadd.s32 7, %s852_s16  ;;  %s277_s6 = sld [smem:[#allocation4 + %s276_s11]]  ;;  %v358_v2 = vcvt.s32.f32 %v353_v1  ;;  %v367_v17 = vrot.slane %v357_v15, %v366_v16  ;;  %v372_v18 = vrot.slane %v355_v13, %v366_v16 }
  0x52   : > { %s289_s8 = sld [smem:[#allocation4 + %s288_s12]]  ;;  %p953_p1 = scmp.ne.s32.totalorder %s944_s7, 0 }
  0x53   : > { %s301_s13 = sld [smem:[#allocation4 + %s300_s14]]  ;;  %361 = vperm.xlu0 %591, %v358_v2  }
  0x54   : > { %s313_s2 = sld [smem:[#allocation4 + %s312_s17]] }
  0x55   : > { %s325_s30 = sld [smem:[#allocation4 + %s324_s21]] }
  0x56   : > { %s337_s26 = sld [smem:[#allocation4 + %s336_s22]]  ;;  %s266_s25 = scalar_lea.vmem [#allocation5], %s265_s28 }
  0x57   : > { %s349_s10 = sld [smem:[#allocation4 + %s348_s29]]  ;;  %v267_v3 = vld [vmem:[%s266_s25] sm:$0x1]  ;;  %s278_s0 = scalar_lea.vmem [#allocation5], %s277_s6 }
  0x58   : > { %268 = vst [vmem:[#allocation2] sm:$0x1] %v267_v3  ;;  %v279_v4 = vld [vmem:[%s278_s0] sm:$0x1]  ;;  %s290_s15 = scalar_lea.vmem [#allocation5], %s289_s8  ;;  %s880_s8 = scalar_lea.hbm %s932_s5, %s852_s16 }
  0x59   : > { %280 = vst [vmem:[#allocation2 + $0x1] sm:$0x1] %v279_v4  ;;  %v291_v5 = vld [vmem:[%s290_s15] sm:$0x1]  ;;  %s302_s18 = scalar_lea.vmem [#allocation5], %s301_s13  ;;  %s723_s15 = smov [#allocation8]  }
  0x5a   : > { %v303_v6 = vld [vmem:[%s302_s18] sm:$0x1]  ;;  %292 = vst [vmem:[#allocation2 + $0x2] sm:$0x1] %v291_v5  ;;  %s314_s11 = scalar_lea.vmem [#allocation5], %s313_s2  ;;  %s636_s18 = sshll.u32 %s723_s15, 4  ;;  %s637_s18 = int_to_ptr.vmem [resolvable:$false] %s636_s18 }
  0x5b   : > { %304 = vst [vmem:[#allocation2 + $0x3] sm:$0x1] %v303_v6  ;;  %v315_v7 = vld [vmem:[%s314_s11] sm:$0x1]  ;;  %s326_s12 = scalar_lea.vmem [#allocation5], %s325_s30  ;;  %s243_s30 = sand.u32 1, %s700_s24  }
  0x5c   : > { %v327_v8 = vld [vmem:[%s326_s12] sm:$0x1]  ;;  %316 = vst [vmem:[#allocation2 + $0x4] sm:$0x1] %v315_v7  ;;  %s338_s14 = scalar_lea.vmem [#allocation5], %s337_s26  ;;  %s507_s26 = sshll.u32 %s243_s30, 3 }
  0x5d   : > { %328 = vst [vmem:[#allocation2 + $0x5] sm:$0x1] %v327_v8  ;;  %v339_v9 = vld [vmem:[%s338_s14] sm:$0x1]  ;;  %s350_s17 = scalar_lea.vmem [#allocation5], %s349_s10  ;;  %s245_s22 = scalar_lea.vmem [#allocation8], %s507_s26 }
  0x5e   : > { %v351_v10 = vld [vmem:[%s350_s17] sm:$0x1]  ;;  %340 = vst [vmem:[#allocation2 + $0x6] sm:$0x1] %v339_v9  ;;  %s393_s28 = sshll.u32 %s245_s22, 4  ;;  %s379_s13 = scalar_lea.sflag [#allocation7], %s243_s30  ;;  %s882_s28 = int_to_ptr.vmem [resolvable:$true] %s393_s28 }
  0x5f   : > { %352 = vst [vmem:[#allocation2 + $0x7] sm:$0x1] %v351_v10  ;;  %s632_s25 = scalar_lea.vmem %s882_s28, 128  ;;  %s638_s11 = scalar_lea.vmem %s637_s18, 256 }
  0x60   : > { %p633_p13 = scmp.ne.s32.totalorder %s882_s28, %s632_s25  ;;  %p639_p6 = scmp.lt.s32.totalorder %s882_s28, %s637_s18 }
  0x61   : > { %p640_p8 = scmp.lt.s32.totalorder %s638_s11, %s632_s25 }
  0x62   : > { %p634_p2 = pnand %p633_p13, %p953_p1 }
  0x63   : > { %p641_p10 = por %p640_p8, %p639_p6 }
  0x64   : > { %p635_p4 = pneg %p634_p2 }
  0x66   : > { %v354_v21 = vld [vmem:[#allocation2] sm:$0xff]  ;;  %p642_p11 = pnand %p641_p10, %p635_p4 }
  0xd2   : > { %v362_v19 = vpop.permute.xlu0 %361 }
  0xd3   : > { %v368_v20 = vmul.f32 %v367_v17, %v362_v19 }
  0xd5   : > { %v373_v22 = vadd.f32 %v372_v18, %v368_v20 }
  0xd7   : > { %v374_v24 = vadd.f32 %v373_v22, %v354_v21 }
  0xd9   : > { %v376_v25 = vadd.f32 %v375_v23, %v374_v24 }
  0xdb   : > { %377 = vst [vmem:[%s245_s22] sm:$0xff] %v376_v25 }
  0xdc   : > { %645 = shalt.err (!%p642_p11)
}
  0xdd   : > { %s646_s16 = scalar_lea.hbm %s880_s8, 128  ;;  %s650_s17 = scalar_lea.hbm %s932_s5, 256 }
  0xde   : > { %p647_p12 = scmp.ne.s32.totalorder %s880_s8, %s646_s16  ;;  %p651_p5 = scmp.lt.u32.totalorder %s880_s8, %s932_s5 }
  0xdf   : > { %p652_p7 = scmp.lt.u32.totalorder %s650_s17, %s646_s16  ;;  %p654_p13 = scmp.lt.u32.totalorder %s646_s16, %s880_s8 }
  0xe0   : > { %p648_p0 = pnand %p647_p12, %p953_p1 }
  0xe1   : > { %p653_p9 = por %p652_p7, %p651_p5 }
  0xe2   : > { %p649_p3 = pneg %p648_p0 }
  0xe3   : > { %p655_p2 = por %p654_p13, %p653_p9 }
  0xe5   : > { %p656_p4 = pnand %p655_p2, %p649_p3 }
  0xe7   : > { %659 = shalt.err (!%p656_p4)
}
  0xe8   : > { %525 = dma.vmem_to_hbm [thread:$0]  (%p953_p1), %s882_s28, 128, %s880_s8, %s379_s13  }
  0xe9 PF: > { %p537_p6 = scmp.ge.s32.totalorder %s716_s27, 2  ;;  %s405_s20 = sand.u32 1, %s696_s23  }
  0xea   : > { %p954_p8 = scmp.ne.s32.totalorder %s945_s9, 0  ;;  %s406_s2 = scalar_lea.sflag [#allocation7], %s405_s20 }
  0xec   : > { %p532_p10 = pnand %p537_p6, %p954_p8 }
  0xee   : > { %691 = dma.done.wait (!%p532_p10), %s406_s2, 128  }
  0xef   : > { %693 = vsyncadd (!%p532_p10), %s406_s2, 4294967168  ;;  %s25_s27 = sadd.s32 1, %s716_s27   ;;  %s955_s30 = sld [smem:[#allocation12_spill]] }
  0xf0   : > { %p22_p11 = scmp.ge.s32.totalorder %s25_s27, 4   ;;  %s956_s0 = sld [smem:[#allocation15_spill]] }
  0xf1   : > { %s957_s25 = sld [smem:[#allocation13_spill]]  ;;  %s958_s26 = sld [smem:[#allocation14_spill]] }
  0xf2   : > { %s959_s23 = smov %s700_s24  ;;  %24 = sbr.rel (!%p22_p11) target bundleno = 20 (0x14), region = 87 }
  0xf5   : > { %s960_s24 = smov %s955_s30 }
  0xf9   :  { %411 = vsyncpa [#allocation6], 1 }
  0xfa   :  { %413 = vsyncpa [#allocation6 + $0x1], 1 }
  0xfb   :  { %414 = vsyncpa [#allocation7], 1 }
  0xfc   :  { %416 = vsyncpa [#allocation7 + $0x1], 1 }

</bundles_post_ra>
